<compile_context>
chip_gen: v6e
topology: v6e:2x2x1
jax: 0.10.0
libtpu: 0.0.40
codegen_flags: <defaults>
</compile_context>

<pallas_src>
import functools

import jax
import jax.numpy as jnp
from jax.experimental import pallas as pl
from jax.experimental.pallas import tpu as pltpu

_LANE = 128


def _round_up(n, m):
    return ((n + m - 1) // m) * m


def moe_first_pass_kernel(x_ref, wg_ref, bg_ref, we_ref, be_ref, out_ref,
                          wtok_ref, acc_ref, *, num_experts, top_k,
                          compute_dtype):
    e = pl.program_id(1)

    # ---- gate / softmax / top-k: once per token tile (e == 0) --------------
    @pl.when(e == 0)
    def _init():
        x = x_ref[...].astype(compute_dtype)
        logits = jnp.dot(x, wg_ref[...], preferred_element_type=jnp.float32)
        logits = logits + bg_ref[...].astype(jnp.float32)            # [tm, E]
        m = jnp.max(logits, axis=-1, keepdims=True)
        ex = jnp.exp(logits - m)
        denom = jnp.sum(ex, axis=-1, keepdims=True)
        r = pl.reciprocal(denom, approx=True)                        # EUP slot
        r = r * (2.0 - denom * r)            # one Newton step -> ~f32 exact
        probs = ex * r                                               # [tm, E]

        # top-k mask (ties broken toward the lower expert id, matching topk)
        e_idx = jax.lax.broadcasted_iota(jnp.int32, probs.shape, 1)
        rank = jnp.zeros_like(probs)
        for j in range(num_experts):         # E small & static; runs once/tile
            pj = probs[:, j:j + 1]                                   # [tm, 1]
            rank = rank + (pj > probs).astype(jnp.float32)
            rank = rank + jnp.where((pj == probs) & (j < e_idx), 1.0, 0.0)
        gated = jnp.where(rank < float(top_k), probs, 0.0)

        # Per-expert routing-weight columns -> (E, tm, 1) scratch so each
        # expert step is one cheap dynamic-indexed read.
        for j in range(num_experts):
            wtok_ref[j] = gated[:, j:j + 1]
        acc_ref[...] = jnp.zeros_like(acc_ref)

    # ---- expert e: bf16 MXU matmul, f32 accumulate --------------------------
    x = x_ref[...].astype(compute_dtype)
    y = jnp.dot(x, we_ref[...], preferred_element_type=jnp.float32)  # [tm, H]
    y = y + be_ref[...].astype(jnp.float32)
    acc_ref[...] += wtok_ref[e] * y

    @pl.when(e == num_experts - 1)
    def _finalize():
        out_ref[...] = acc_ref[...].astype(out_ref.dtype)


def _vmem_capacity_bytes():
    try:
        return int(pltpu.get_tpu_info().vmem_capacity_bytes)
    except Exception:
        return 64 << 20          # conservative fallback (v7x: 64 MiB / TC)


def _pick_tm(T, H, E, x_bytes, w_bytes, vmem_cap, weight_buffers, tm_req):
    """Largest token tile that (a) fits the VMEM budget with headroom,
    (b) leaves >=2 token tiles for megacore sharding, (c) stays MXU-aligned."""
    budget = max(vmem_cap - (8 << 20), 8 << 20)
    H_pad = _round_up(H, _LANE)
    E_pad = _round_up(E, _LANE)
    fixed = (weight_buffers * H * H_pad * w_bytes       # streamed expert weight
             + 2 * H * E_pad * w_bytes                  # gate weight
             + (1 << 20))                               # biases + slack
    per_tok = (2 * H_pad * x_bytes        # x blocks (double buffered)
               + 2 * H_pad * x_bytes      # out blocks (double buffered)
               + H_pad * 4                # f32 accumulator
               + E * _LANE * 4)           # routing-weight scratch (lane padded)
    tm_cap = max((budget - fixed) // per_tok, 8)
    tm = 1024 if tm_req is None else tm_req   # amortize weight re-streaming
    tm = min(tm, tm_cap)
    if T > 8:                       # keep >=2 token tiles (v7x has 2 TCs)
        tm = min(tm, _round_up(pl.cdiv(T, 2), 8))
    tm = min(tm, _round_up(T, 8))
    tm = (tm // _LANE) * _LANE if tm >= _LANE else _round_up(max(tm, 8), 8)
    return int(max(tm, 8))


def dual_output_moe_first_pass(x, wg, bg, we, be, *, top_k=2, tm=None,
                               compute_dtype=jnp.bfloat16, weight_buffers=2):
    """x: [B,S,H]; wg: [H,E]; bg: [E]; we: [E,H,H]; be: [E,H]."""
    B, S, H = x.shape
    T = B * S
    E = wg.shape[1]

    # bf16 MXU path (f32 accumulate): cast weights once on the host; x is cast
    # in-kernel.  Halves the dominant expert-weight HBM stream.
    wg_c = wg.astype(compute_dtype)
    we_c = we.astype(compute_dtype)

    x_bytes = jnp.dtype(x.dtype).itemsize
    w_bytes = jnp.dtype(compute_dtype).itemsize
    vmem_cap = _vmem_capacity_bytes()

    tm_eff = _pick_tm(T, H, E, x_bytes, w_bytes, vmem_cap, weight_buffers, tm)
    Tp = _round_up(T, tm_eff)
    n_tiles = Tp // tm_eff

    x2 = x.reshape(T, H)
    if Tp != T:
        x2 = jnp.pad(x2, ((0, Tp - T), (0, 0)))      # padded rows dropped below
    bg2 = bg.reshape(1, E)
    be2 = be.reshape(E, 1, H)

    H_pad = _round_up(H, _LANE)
    E_pad = _round_up(E, _LANE)

    # VMEM footprint estimate -> explicit generation-aware limit (<= physical).
    vmem_est = (2 * tm_eff * H_pad * x_bytes           # x blocks
                + 2 * tm_eff * H_pad * x_bytes         # out blocks
                + weight_buffers * H * H_pad * w_bytes  # streamed expert weight
                + 2 * H * E_pad * w_bytes + 2 * E_pad * 4 + 2 * H_pad * 4
                + tm_eff * H_pad * 4                   # f32 accumulator
                + E * tm_eff * _LANE * 4)              # routing-weight scratch
    vmem_limit = int(min(max(int(1.5 * vmem_est) + (4 << 20), 16 << 20),
                         vmem_cap - (4 << 20)))

    # Expert weights are re-streamed once per token tile -> count that.
    cost = pl.CostEstimate(
        flops=int(2 * Tp * H * H * E + 2 * Tp * H * E),
        transcendentals=int(Tp * E),
        bytes_accessed=int(2 * Tp * H * x_bytes                       # x + out
                           + n_tiles * E * H * H * w_bytes            # we stream
                           + H * E_pad * w_bytes                      # gate w
                           + n_tiles * E * H_pad * 4 + E_pad * 4),    # biases
    )

    we_spec_kwargs = {}
    if weight_buffers != 2:
        # e.g. v5e: deeper weight pipeline to hide exposed DMA (128 MiB VMEM).
        we_spec_kwargs = dict(pipeline_mode=pl.Buffered(weight_buffers))
    we_spec = pl.BlockSpec((None, H, H), lambda i, e: (e, 0, 0),
                           **we_spec_kwargs)

    kernel = functools.partial(moe_first_pass_kernel, num_experts=E,
                               top_k=top_k, compute_dtype=compute_dtype)
    out = pl.pallas_call(
        kernel,
        out_shape=jax.ShapeDtypeStruct((Tp, H), x.dtype),
        grid_spec=pltpu.PrefetchScalarGridSpec(
            num_scalar_prefetch=0,
            grid=(n_tiles, E),
            in_specs=[
                pl.BlockSpec((tm_eff, H), lambda i, e: (i, 0)),       # tokens
                pl.BlockSpec((H, E), lambda i, e: (0, 0)),            # gate w
                pl.BlockSpec((1, E), lambda i, e: (0, 0)),            # gate b
                we_spec,                                              # expert w
                pl.BlockSpec((None, 1, H), lambda i, e: (e, 0, 0)),   # expert b
            ],
            out_specs=pl.BlockSpec((tm_eff, H), lambda i, e: (i, 0)),
            scratch_shapes=[
                pltpu.VMEM((E, tm_eff, 1), jnp.float32),   # routing weights
                pltpu.VMEM((tm_eff, H), jnp.float32),      # f32 accumulator
            ],
        ),
        compiler_params=pltpu.CompilerParams(
            dimension_semantics=("parallel", "arbitrary"),
            vmem_limit_bytes=vmem_limit,
        ),
        cost_estimate=cost,
    )(x2, wg_c, bg2, we_c, be2)
    return out[:T].reshape(B, S, H)


def reference_first_pass(x, wg, bg, we, be, top_k=2, compute_dtype=None):
    """Pure-JAX reference matching the PyTorch forward_first_pass combine.
    `compute_dtype` rounds x / weights the same way the kernel does so the
    comparison exercises routing + gating + combine, not matmul precision."""
    B, S, H = x.shape
    f32 = jnp.float32
    xr = x.reshape(-1, H)
    if compute_dtype is not None:
        xr = xr.astype(compute_dtype)
        wg = wg.astype(compute_dtype)
        we = we.astype(compute_dtype)
    xr, wg, we = xr.astype(f32), wg.astype(f32), we.astype(f32)
    hp = jax.lax.Precision.HIGHEST
    probs = jax.nn.softmax(jnp.dot(xr, wg, precision=hp) + bg, axis=-1)
    tkp, tki = jax.lax.top_k(probs, top_k)
    out = jnp.zeros_like(xr)
    for e in range(wg.shape[1]):
        w_tok = jnp.sum(jnp.where(tki == e, tkp, 0.0), axis=-1)  # 0 if unrouted
        out = out + w_tok[:, None] * (jnp.dot(xr, we[e], precision=hp) + be[e])
    return out.reshape(B, S, H)


if __name__ == "__main__":
    B, S, H, E, TOP_K = 2, 8, 32, 4, 2

    key = jax.random.PRNGKey(0)
    kx, kg, kbg, kw, kb = jax.random.split(key, 5)

    x = jax.random.normal(kx, (B, S, H), dtype=jnp.float32)
    # Deterministic "synthetic checkpoint": gate = Linear(H,E), experts = Linear(H,H)
    wg = jax.random.normal(kg, (H, E), dtype=jnp.float32) * (1.0 / jnp.sqrt(H))
    bg = jax.random.normal(kbg, (E,), dtype=jnp.float32) * 0.1
    we = jax.random.normal(kw, (E, H, H), dtype=jnp.float32) * (1.0 / jnp.sqrt(H))
    be = jax.random.normal(kb, (E, H), dtype=jnp.float32) * 0.1

    out = dual_output_moe_first_pass(x, wg, bg, we, be, top_k=TOP_K)
    out = jax.block_until_ready(out)
    assert out.shape == (B, S, H)

    # bf16-class tolerance: reference uses the same bf16-rounded operands.
    ref = reference_first_pass(x, wg, bg, we, be, top_k=TOP_K,
                               compute_dtype=jnp.bfloat16)
    assert jnp.allclose(out, ref, atol=5e-3, rtol=5e-3), "mismatch vs reference"

    print("KERNEL_OK")
</pallas_src>

<mosaic_0001>
module attributes {stable_mosaic.version = 11 : i64} {
  func.func @moe_first_pass_kernel(%arg0: i32, %arg1: i32, %arg2: memref<8x32xf32, #tpu.memory_space<vmem>>, %arg3: memref<32x4xbf16, #tpu.memory_space<vmem>>, %arg4: memref<1x4xf32, #tpu.memory_space<vmem>>, %arg5: memref<1x32x32xbf16, #tpu.memory_space<vmem>>, %arg6: memref<1x1x32xf32, #tpu.memory_space<vmem>>, %arg7: memref<8x32xf32, #tpu.memory_space<vmem>>, %arg8: memref<4x8x1xf32, #tpu.memory_space<vmem>>, %arg9: memref<8x32xf32, #tpu.memory_space<vmem>>) attributes {dimension_semantics = [#tpu.dimension_semantics<parallel>, #tpu.dimension_semantics<arbitrary>], iteration_bounds = array<i64: 2, 4>, scalar_prefetch = 0 : i64, scratch_operands = 2 : i64, tpu.core_type = #tpu.core_type<tc>, window_params = [{transform_indices = @transform_0, window_bounds = array<i64: 8, 32>}, {pipeline_mode = #tpu.pipeline_mode<synchronous>, transform_indices = @transform_1, window_bounds = array<i64: 32, 4>}, {pipeline_mode = #tpu.pipeline_mode<synchronous>, transform_indices = @transform_2, window_bounds = array<i64: 1, 4>}, {transform_indices = @transform_3, window_bounds = array<i64: 1, 32, 32>}, {transform_indices = @transform_4, window_bounds = array<i64: 1, 1, 32>}, {transform_indices = @transform_5, window_bounds = array<i64: 8, 32>}]} {
    %c0_i32 = arith.constant 0 : i32
    %0 = arith.cmpi eq, %arg1, %c0_i32 : i32
    %1 = arith.extui %0 : i1 to i32
    %c0_i32_0 = arith.constant 0 : i32
    %2 = arith.cmpi ne, %1, %c0_i32_0 : i32
    scf.if %2 {
      %c0_15 = arith.constant 0 : index
      %c0_16 = arith.constant 0 : index
      %23 = vector.load %arg2[%c0_15, %c0_16] : memref<8x32xf32, #tpu.memory_space<vmem>>, vector<8x32xf32>
      %24 = arith.truncf %23 : vector<8x32xf32> to vector<8x32xbf16>
      %c0_17 = arith.constant 0 : index
      %c0_18 = arith.constant 0 : index
      %25 = vector.load %arg3[%c0_17, %c0_18] : memref<32x4xbf16, #tpu.memory_space<vmem>>, vector<32x4xbf16>
      %cst_19 = arith.constant dense<0.000000e+00> : vector<8x4xf32>
      %26 = tpu.matmul %24, %25, %cst_19 {dimension_numbers = #tpu.dot_dimension_numbers<[1], [0], [0], [1], [0, 0, 1, 1], [], []>} : vector<8x32xbf16>, vector<32x4xbf16>, vector<8x4xf32> -> vector<8x4xf32>
      %c0_20 = arith.constant 0 : index
      %c0_21 = arith.constant 0 : index
      %27 = vector.load %arg4[%c0_20, %c0_21] : memref<1x4xf32, #tpu.memory_space<vmem>>, vector<1x4xf32>
      %28 = vector.broadcast %27 : vector<1x4xf32> to vector<8x4xf32>
      %29 = arith.addf %26, %28 : vector<8x4xf32>
      %cst_22 = arith.constant dense<0xFF800000> : vector<8xf32>
      %30 = vector.multi_reduction <maximumf>, %29, %cst_22 [1] : vector<8x4xf32> to vector<8xf32>
      %31 = vector.shape_cast %30 : vector<8xf32> to vector<8x1xf32>
      %32 = vector.broadcast %31 : vector<8x1xf32> to vector<8x4xf32>
      %33 = arith.subf %29, %32 : vector<8x4xf32>
      %34 = math.exp %33 : vector<8x4xf32>
      %cst_23 = arith.constant dense<0.000000e+00> : vector<8xf32>
      %35 = vector.multi_reduction <add>, %34, %cst_23 [1] : vector<8x4xf32> to vector<8xf32>
      %36 = vector.shape_cast %35 : vector<8xf32> to vector<8x1xf32>
      %37 = tpu.reciprocal %36 {approx = true} : vector<8x1xf32> -> vector<8x1xf32>
      %38 = arith.mulf %36, %37 : vector<8x1xf32>
      %cst_24 = arith.constant 2.000000e+00 : f32
      %39 = vector.broadcast %cst_24 : f32 to vector<8x1xf32>
      %40 = arith.subf %39, %38 : vector<8x1xf32>
      %41 = arith.mulf %37, %40 : vector<8x1xf32>
      %42 = vector.broadcast %41 : vector<8x1xf32> to vector<8x4xf32>
      %43 = arith.mulf %34, %42 : vector<8x4xf32>
      %44 = tpu.iota {dimensions = array<i32: 1>} : vector<8x4xi32>
      %cst_25 = arith.constant 0.000000e+00 : f32
      %45 = vector.broadcast %cst_25 : f32 to vector<8x4xf32>
      %46 = vector.extract_strided_slice %43 {offsets = [0, 0], sizes = [8, 1], strides = [1, 1]} : vector<8x4xf32> to vector<8x1xf32>
      %47 = vector.broadcast %46 : vector<8x1xf32> to vector<8x4xf32>
      %48 = arith.cmpf ogt, %47, %43 : vector<8x4xf32>
      %49 = arith.extui %48 : vector<8x4xi1> to vector<8x4xi32>
      %50 = arith.sitofp %49 : vector<8x4xi32> to vector<8x4xf32>
      %51 = arith.addf %45, %50 : vector<8x4xf32>
      %52 = vector.broadcast %46 : vector<8x1xf32> to vector<8x4xf32>
      %53 = arith.cmpf oeq, %52, %43 : vector<8x4xf32>
      %c0_i32_26 = arith.constant 0 : i32
      %54 = vector.broadcast %c0_i32_26 : i32 to vector<8x4xi32>
      %55 = arith.cmpi sgt, %44, %54 : vector<8x4xi32>
      %56 = arith.andi %53, %55 : vector<8x4xi1>
      %cst_27 = arith.constant 1.000000e+00 : f32
      %cst_28 = arith.constant 0.000000e+00 : f32
      %57 = vector.broadcast %cst_27 : f32 to vector<8x4xf32>
      %58 = vector.broadcast %cst_28 : f32 to vector<8x4xf32>
      %59 = arith.select %56, %57, %58 : vector<8x4xi1>, vector<8x4xf32>
      %60 = arith.addf %51, %59 : vector<8x4xf32>
      %61 = vector.extract_strided_slice %43 {offsets = [0, 1], sizes = [8, 1], strides = [1, 1]} : vector<8x4xf32> to vector<8x1xf32>
      %62 = vector.broadcast %61 : vector<8x1xf32> to vector<8x4xf32>
      %63 = arith.cmpf ogt, %62, %43 : vector<8x4xf32>
      %64 = arith.extui %63 : vector<8x4xi1> to vector<8x4xi32>
      %65 = arith.sitofp %64 : vector<8x4xi32> to vector<8x4xf32>
      %66 = arith.addf %60, %65 : vector<8x4xf32>
      %67 = vector.broadcast %61 : vector<8x1xf32> to vector<8x4xf32>
      %68 = arith.cmpf oeq, %67, %43 : vector<8x4xf32>
      %c1_i32 = arith.constant 1 : i32
      %69 = vector.broadcast %c1_i32 : i32 to vector<8x4xi32>
      %70 = arith.cmpi sgt, %44, %69 : vector<8x4xi32>
      %71 = arith.andi %68, %70 : vector<8x4xi1>
      %cst_29 = arith.constant 1.000000e+00 : f32
      %cst_30 = arith.constant 0.000000e+00 : f32
      %72 = vector.broadcast %cst_29 : f32 to vector<8x4xf32>
      %73 = vector.broadcast %cst_30 : f32 to vector<8x4xf32>
      %74 = arith.select %71, %72, %73 : vector<8x4xi1>, vector<8x4xf32>
      %75 = arith.addf %66, %74 : vector<8x4xf32>
      %76 = vector.extract_strided_slice %43 {offsets = [0, 2], sizes = [8, 1], strides = [1, 1]} : vector<8x4xf32> to vector<8x1xf32>
      %77 = vector.broadcast %76 : vector<8x1xf32> to vector<8x4xf32>
      %78 = arith.cmpf ogt, %77, %43 : vector<8x4xf32>
      %79 = arith.extui %78 : vector<8x4xi1> to vector<8x4xi32>
      %80 = arith.sitofp %79 : vector<8x4xi32> to vector<8x4xf32>
      %81 = arith.addf %75, %80 : vector<8x4xf32>
      %82 = vector.broadcast %76 : vector<8x1xf32> to vector<8x4xf32>
      %83 = arith.cmpf oeq, %82, %43 : vector<8x4xf32>
      %c2_i32 = arith.constant 2 : i32
      %84 = vector.broadcast %c2_i32 : i32 to vector<8x4xi32>
      %85 = arith.cmpi sgt, %44, %84 : vector<8x4xi32>
      %86 = arith.andi %83, %85 : vector<8x4xi1>
      %cst_31 = arith.constant 1.000000e+00 : f32
      %cst_32 = arith.constant 0.000000e+00 : f32
      %87 = vector.broadcast %cst_31 : f32 to vector<8x4xf32>
      %88 = vector.broadcast %cst_32 : f32 to vector<8x4xf32>
      %89 = arith.select %86, %87, %88 : vector<8x4xi1>, vector<8x4xf32>
      %90 = arith.addf %81, %89 : vector<8x4xf32>
      %91 = vector.extract_strided_slice %43 {offsets = [0, 3], sizes = [8, 1], strides = [1, 1]} : vector<8x4xf32> to vector<8x1xf32>
      %92 = vector.broadcast %91 : vector<8x1xf32> to vector<8x4xf32>
      %93 = arith.cmpf ogt, %92, %43 : vector<8x4xf32>
      %94 = arith.extui %93 : vector<8x4xi1> to vector<8x4xi32>
      %95 = arith.sitofp %94 : vector<8x4xi32> to vector<8x4xf32>
      %96 = arith.addf %90, %95 : vector<8x4xf32>
      %97 = vector.broadcast %91 : vector<8x1xf32> to vector<8x4xf32>
      %98 = arith.cmpf oeq, %97, %43 : vector<8x4xf32>
      %c3_i32_33 = arith.constant 3 : i32
      %99 = vector.broadcast %c3_i32_33 : i32 to vector<8x4xi32>
      %100 = arith.cmpi sgt, %44, %99 : vector<8x4xi32>
      %101 = arith.andi %98, %100 : vector<8x4xi1>
      %cst_34 = arith.constant 1.000000e+00 : f32
      %cst_35 = arith.constant 0.000000e+00 : f32
      %102 = vector.broadcast %cst_34 : f32 to vector<8x4xf32>
      %103 = vector.broadcast %cst_35 : f32 to vector<8x4xf32>
      %104 = arith.select %101, %102, %103 : vector<8x4xi1>, vector<8x4xf32>
      %105 = arith.addf %96, %104 : vector<8x4xf32>
      %cst_36 = arith.constant 2.000000e+00 : f32
      %106 = vector.broadcast %cst_36 : f32 to vector<8x4xf32>
      %107 = arith.cmpf olt, %105, %106 : vector<8x4xf32>
      %cst_37 = arith.constant 0.000000e+00 : f32
      %108 = vector.broadcast %cst_37 : f32 to vector<8x4xf32>
      %109 = arith.select %107, %43, %108 : vector<8x4xi1>, vector<8x4xf32>
      %110 = vector.extract_strided_slice %109 {offsets = [0, 0], sizes = [8, 1], strides = [1, 1]} : vector<8x4xf32> to vector<8x1xf32>
      %c0_38 = arith.constant 0 : index
      %c0_39 = arith.constant 0 : index
      %c0_40 = arith.constant 0 : index
      %111 = vector.load %arg8[%c0_38, %c0_39, %c0_40] : memref<4x8x1xf32, #tpu.memory_space<vmem>>, vector<1x8x1xf32>
      %112 = vector.shape_cast %111 : vector<1x8x1xf32> to vector<8x1xf32>
      %113 = vector.shape_cast %110 : vector<8x1xf32> to vector<1x8x1xf32>
      tpu.vector_store %arg8[%c0_38, %c0_39, %c0_40], %113 {strides = array<i32>} : memref<4x8x1xf32, #tpu.memory_space<vmem>>, vector<1x8x1xf32>,
      %114 = vector.extract_strided_slice %109 {offsets = [0, 1], sizes = [8, 1], strides = [1, 1]} : vector<8x4xf32> to vector<8x1xf32>
      %c1 = arith.constant 1 : index
      %c0_41 = arith.constant 0 : index
      %c0_42 = arith.constant 0 : index
      %115 = vector.load %arg8[%c1, %c0_41, %c0_42] : memref<4x8x1xf32, #tpu.memory_space<vmem>>, vector<1x8x1xf32>
      %116 = vector.shape_cast %115 : vector<1x8x1xf32> to vector<8x1xf32>
      %117 = vector.shape_cast %114 : vector<8x1xf32> to vector<1x8x1xf32>
      tpu.vector_store %arg8[%c1, %c0_41, %c0_42], %117 {strides = array<i32>} : memref<4x8x1xf32, #tpu.memory_space<vmem>>, vector<1x8x1xf32>,
      %118 = vector.extract_strided_slice %109 {offsets = [0, 2], sizes = [8, 1], strides = [1, 1]} : vector<8x4xf32> to vector<8x1xf32>
      %c2 = arith.constant 2 : index
      %c0_43 = arith.constant 0 : index
      %c0_44 = arith.constant 0 : index
      %119 = vector.load %arg8[%c2, %c0_43, %c0_44] : memref<4x8x1xf32, #tpu.memory_space<vmem>>, vector<1x8x1xf32>
      %120 = vector.shape_cast %119 : vector<1x8x1xf32> to vector<8x1xf32>
      %121 = vector.shape_cast %118 : vector<8x1xf32> to vector<1x8x1xf32>
      tpu.vector_store %arg8[%c2, %c0_43, %c0_44], %121 {strides = array<i32>} : memref<4x8x1xf32, #tpu.memory_space<vmem>>, vector<1x8x1xf32>,
      %122 = vector.extract_strided_slice %109 {offsets = [0, 3], sizes = [8, 1], strides = [1, 1]} : vector<8x4xf32> to vector<8x1xf32>
      %c3 = arith.constant 3 : index
      %c0_45 = arith.constant 0 : index
      %c0_46 = arith.constant 0 : index
      %123 = vector.load %arg8[%c3, %c0_45, %c0_46] : memref<4x8x1xf32, #tpu.memory_space<vmem>>, vector<1x8x1xf32>
      %124 = vector.shape_cast %123 : vector<1x8x1xf32> to vector<8x1xf32>
      %125 = vector.shape_cast %122 : vector<8x1xf32> to vector<1x8x1xf32>
      tpu.vector_store %arg8[%c3, %c0_45, %c0_46], %125 {strides = array<i32>} : memref<4x8x1xf32, #tpu.memory_space<vmem>>, vector<1x8x1xf32>,
      %cst_47 = arith.constant 0.000000e+00 : f32
      %126 = vector.broadcast %cst_47 : f32 to vector<8x32xf32>
      %c0_48 = arith.constant 0 : index
      %c0_49 = arith.constant 0 : index
      %127 = vector.load %arg9[%c0_48, %c0_49] : memref<8x32xf32, #tpu.memory_space<vmem>>, vector<8x32xf32>
      tpu.vector_store %arg9[%c0_48, %c0_49], %126 {strides = array<i32>} : memref<8x32xf32, #tpu.memory_space<vmem>>, vector<8x32xf32>,
    } else {
    }
    %c0 = arith.constant 0 : index
    %c0_1 = arith.constant 0 : index
    %3 = vector.load %arg2[%c0, %c0_1] : memref<8x32xf32, #tpu.memory_space<vmem>>, vector<8x32xf32>
    %4 = arith.truncf %3 : vector<8x32xf32> to vector<8x32xbf16>
    %c0_2 = arith.constant 0 : index
    %c0_3 = arith.constant 0 : index
    %c0_4 = arith.constant 0 : index
    %5 = vector.load %arg5[%c0_2, %c0_3, %c0_4] : memref<1x32x32xbf16, #tpu.memory_space<vmem>>, vector<1x32x32xbf16>
    %6 = vector.shape_cast %5 : vector<1x32x32xbf16> to vector<32x32xbf16>
    %cst = arith.constant dense<0.000000e+00> : vector<8x32xf32>
    %7 = tpu.matmul %4, %6, %cst {dimension_numbers = #tpu.dot_dimension_numbers<[1], [0], [0], [1], [0, 0, 1, 1], [], []>} : vector<8x32xbf16>, vector<32x32xbf16>, vector<8x32xf32> -> vector<8x32xf32>
    %c0_5 = arith.constant 0 : index
    %c0_6 = arith.constant 0 : index
    %c0_7 = arith.constant 0 : index
    %8 = vector.load %arg6[%c0_5, %c0_6, %c0_7] : memref<1x1x32xf32, #tpu.memory_space<vmem>>, vector<1x1x32xf32>
    %9 = vector.shape_cast %8 : vector<1x1x32xf32> to vector<1x32xf32>
    %10 = vector.broadcast %9 : vector<1x32xf32> to vector<8x32xf32>
    %11 = arith.addf %7, %10 : vector<8x32xf32>
    %c0_8 = arith.constant 0 : index
    %c0_9 = arith.constant 0 : index
    %12 = vector.load %arg9[%c0_8, %c0_9] : memref<8x32xf32, #tpu.memory_space<vmem>>, vector<8x32xf32>
    %13 = arith.index_cast %arg1 : i32 to index
    %c0_10 = arith.constant 0 : index
    %c0_11 = arith.constant 0 : index
    %14 = vector.load %arg8[%13, %c0_10, %c0_11] : memref<4x8x1xf32, #tpu.memory_space<vmem>>, vector<1x8x1xf32>
    %15 = vector.shape_cast %14 : vector<1x8x1xf32> to vector<8x1xf32>
    %16 = vector.broadcast %15 : vector<8x1xf32> to vector<8x32xf32>
    %17 = arith.mulf %16, %11 : vector<8x32xf32>
    %18 = arith.addf %12, %17 : vector<8x32xf32>
    %c0_12 = arith.constant 0 : index
    %c0_13 = arith.constant 0 : index
    %19 = vector.load %arg9[%c0_12, %c0_13] : memref<8x32xf32, #tpu.memory_space<vmem>>, vector<8x32xf32>
    tpu.vector_store %arg9[%c0_12, %c0_13], %18 {strides = array<i32>} : memref<8x32xf32, #tpu.memory_space<vmem>>, vector<8x32xf32>,
    %c3_i32 = arith.constant 3 : i32
    %20 = arith.cmpi eq, %arg1, %c3_i32 : i32
    %21 = arith.extui %20 : i1 to i32
    %c0_i32_14 = arith.constant 0 : i32
    %22 = arith.cmpi ne, %21, %c0_i32_14 : i32
    scf.if %22 {
      %c0_15 = arith.constant 0 : index
      %c0_16 = arith.constant 0 : index
      %23 = vector.load %arg9[%c0_15, %c0_16] : memref<8x32xf32, #tpu.memory_space<vmem>>, vector<8x32xf32>
      %c0_17 = arith.constant 0 : index
      %c0_18 = arith.constant 0 : index
      %24 = vector.load %arg7[%c0_17, %c0_18] : memref<8x32xf32, #tpu.memory_space<vmem>>, vector<8x32xf32>
      tpu.vector_store %arg7[%c0_17, %c0_18], %23 {strides = array<i32>} : memref<8x32xf32, #tpu.memory_space<vmem>>, vector<8x32xf32>,
    } else {
    }
    return
  }
  func.func @transform_0(%arg0: i32, %arg1: i32) -> (i32, i32) {
    %c0_i32 = arith.constant 0 : i32
    %c0_i32_0 = arith.constant 0 : i32
    return %arg0, %c0_i32 : i32, i32
  }
  func.func @transform_1(%arg0: i32, %arg1: i32) -> (i32, i32) {
    %c0_i32 = arith.constant 0 : i32
    %c0_i32_0 = arith.constant 0 : i32
    %c0_i32_1 = arith.constant 0 : i32
    return %c0_i32, %c0_i32_0 : i32, i32
  }
  func.func @transform_2(%arg0: i32, %arg1: i32) -> (i32, i32) {
    %c0_i32 = arith.constant 0 : i32
    %c0_i32_0 = arith.constant 0 : i32
    %c0_i32_1 = arith.constant 0 : i32
    return %c0_i32, %c0_i32_0 : i32, i32
  }
  func.func @transform_3(%arg0: i32, %arg1: i32) -> (i32, i32, i32) {
    %c0_i32 = arith.constant 0 : i32
    %c0_i32_0 = arith.constant 0 : i32
    %c0_i32_1 = arith.constant 0 : i32
    return %arg1, %c0_i32, %c0_i32_0 : i32, i32, i32
  }
  func.func @transform_4(%arg0: i32, %arg1: i32) -> (i32, i32, i32) {
    %c0_i32 = arith.constant 0 : i32
    %c0_i32_0 = arith.constant 0 : i32
    %c0_i32_1 = arith.constant 0 : i32
    return %arg1, %c0_i32, %c0_i32_0 : i32, i32, i32
  }
  func.func @transform_5(%arg0: i32, %arg1: i32) -> (i32, i32) {
    %c0_i32 = arith.constant 0 : i32
    %c0_i32_0 = arith.constant 0 : i32
    return %arg0, %c0_i32 : i32, i32
  }
}

</mosaic_0001>

<bundles_post_ra>
// kernel: tpu_custom_call.1
= control target key start
LH: loop header
LB: loop body
LE: loop exit
PB: predicated region body
PF: predicated region fallthrough
CT: control target
= control target key end

     0   :  { %10 = vsyncpa [#allocation5], 0  ;;  %s1277_s0 = inlined_call_operand.vmem [shape: f32[16,32], index: 0, kind: input, shape index: {}]   ;;  %s1278_s1 = inlined_call_operand.vmem [shape: bf16[32,4], index: 1, kind: input, shape index: {}]   ;;  %s1279_s2 = inlined_call_operand.vmem [shape: f32[1,4], index: 2, kind: input, shape index: {}]   ;;  %s1280_s3 = inlined_call_operand.hbm [shape: bf16[4,32,32], index: 3, kind: input, shape index: {}]   ;;  %s1281_s4 = inlined_call_operand.vmem [shape: f32[4,1,32], index: 4, kind: input, shape index: {}]   ;;  %s1282_s5 = inlined_call_operand.hbm [shape: f32[16,32], index: 5, kind: output, shape index: {}]  }
   0x1   :  { %12 = vsyncpa [#allocation5 + $0x1], 0 }
   0x2   :  { %13 = vsyncpa [#allocation6], 0 }
   0x3   :  { %15 = vsyncpa [#allocation6 + $0x1], 0  ;;  %s1035_s18 = smov 0   ;;  %s1037_s19 = smov 0  }
   0x4   :  { %s1039_s20 = smov 0   ;;  %s1041_s21 = smov 0  }
   0x5   :  { %s1043_s22 = smov 0   ;;  %s1045_s23 = smov 0  }
   0x6   :  { %s1047_s24 = smov 0   ;;  %s1049_s25 = smov 0  }
   0x7   :  { %s1051_s26 = smov 0   ;;  %s1053_s27 = smov 0  }
   0x8   :  { %s1055_s28 = smov 0  }
   0x9 LB: > { %1289 = sst [smem:[#allocation10_spill]] %s967_s23  ;;  %s656_s29 = sadd.s32 4294967295, %s987_s28   ;;  %s987_s28 = sphi %s1055_s28, %s21_s28   ;;  %s983_s27 = sphi %s1053_s27, %s1306_s27   ;;  %s979_s26 = sphi %s1051_s26, %s1305_s26   ;;  %s975_s25 = sphi %s1049_s25, %s1304_s25   ;;  %s971_s24 = sphi %s1047_s24, %s1303_s24   ;;  %s967_s23 = sphi %s1045_s23, %s1302_s23   ;;  %s963_s22 = sphi %s1043_s22, %s1311_s22   ;;  %s959_s21 = sphi %s1041_s21, %s1310_s21   ;;  %s955_s20 = sphi %s1039_s20, %s1309_s20   ;;  %s951_s19 = sphi %s1037_s19, %s1308_s19   ;;  %s947_s18 = sphi %s1035_s18, %s1307_s18  }
   0xa   : > { %1290 = sst [smem:[#allocation11_spill]] %s979_s26  ;;  %s657_s30 = sadd.s32 4294967294, %s987_s28  }
   0xb   : > { %1291 = sst [smem:[#allocation12_spill]] %s983_s27  ;;  %s30_s6 = sadd.s32 1, %s979_s26 }
   0xc   : > { %s33_s7 = sadd.s32 1, %s983_s27  ;;  %p31_p0 = scmp.ge.s32.totalorder %s30_s6, 4 }
   0xd   : > { %s108_s8 = sadd.s32 1, %s967_s23  ;;  %p115_p1 = scmp.ne.s32.totalorder %s967_s23, %s963_s22 }
   0xe   : > { %p116_p2 = scmp.eq.s32.totalorder %s987_s28, 0  ;;  %s1313_s6 = smov (%p31_p0, %s30_s6), 0 }
   0xf   : > { %1292 = sst [smem:[#allocation13_spill]] %s1313_s6  ;;  %s1315_s7 = smov (!%p31_p0, %s33_s7), %s983_s27 }
  0x10   : > { %s105_s9 = ssub.s32 %s979_s26, %s1313_s6  ;;  %p1101_p3 = por %p116_p2, %p115_p1 }
  0x11   : > { %p35_p4 = scmp.ge.s32.totalorder %s1315_s7, 2  ;;  %p106_p5 = scmp.eq.s32.totalorder %s105_s9, 0 }
  0x12   : > { %p121_p6 = scmp.ne.s32.totalorder %s963_s22, %s959_s21  ;;  %p122_p7 = scmp.eq.s32.totalorder %s656_s29, 0 }
  0x13   : > { %s1317_s7 = smov (%p35_p4, %s1315_s7), 0  ;;  %s160_s14 = sadd.s32 1, %s955_s20 }
  0x14   : > { %1294 = sst [smem:[#allocation14_spill]] %s1317_s7  ;;  %p1111_p8 = por %p122_p7, %p121_p6 }
  0x15   : > { %s1109_s11 = scalar_select %p106_p5, %s967_s23, %s108_s8  }
  0x16   : > { %s157_s13 = ssub.s32 %s983_s27, %s1317_s7  ;;  %p170_p10 = scmp.ne.s32.totalorder %s955_s20, %s951_s19 }
  0x17   : > { %1295 = sst [smem:[#allocation15_spill]] %s1109_s11  ;;  %p158_p9 = scmp.eq.s32.totalorder %s157_s13, 0 }
  0x18   : > { %p171_p11 = scmp.eq.s32.totalorder %s656_s29, 7  ;;  %p176_p13 = scmp.ne.s32.totalorder %s951_s19, %s947_s18 }
  0x19   : > { %s1121_s15 = scalar_select %p158_p9, %s955_s20, %s160_s14  }
  0x1a   : > { %p1123_p12 = por %p171_p11, %p170_p10  ;;  %p177_p0 = scmp.eq.s32.totalorder %s657_s30, 7 }
  0x1b   : > { %p721_p1 = scmp.lt.s32.totalorder %s987_s28, 8  ;;  %s210_s17 = sand.u32 1, %s967_s23  }
  0x1c   : > { %p1131_p2 = por %p177_p0, %p176_p13  ;;  %s660_s8 = sshll.u32 %s210_s17, 4 }
  0x1d   : > { %s686_s9 = sshll.u32 %s979_s26, 8  ;;  %s214_s14 = scalar_lea.vmem [#allocation4], %s660_s8 }
  0x1e   : > { %s220_s29 = scalar_lea.hbm %s1280_s3, %s686_s9  ;;  %s221_s6 = sshll.u32 %s214_s14, 4  ;;  %s222_s6 = int_to_ptr.vmem [resolvable:$true] %s221_s6 }
  0x1f   : > { %p1141_p4 = pnand %p721_p1, %p1101_p3  ;;  %s211_s30 = scalar_lea.sflag [#allocation5], %s210_s17 }
  0x20   : > { %s852_s11 = scalar_lea.vmem %s222_s6, 256  ;;  %s989_s26 = smov [#allocation4]  }
  0x21   : > { %p841_p5 = pneg %p1141_p4  ;;  %p853_p6 = scmp.ne.s32.totalorder %s222_s6, %s852_s11 }
  0x22   : > { %s857_s23 = sshll.u32 %s989_s26, 4  ;;  %s858_s23 = int_to_ptr.vmem [resolvable:$false] %s857_s23 }
  0x23   : > { %p855_p7 = pnand %p853_p6, %p841_p5  ;;  %s859_s7 = scalar_lea.vmem %s858_s23, 512 }
  0x24   : > { %p860_p10 = scmp.lt.s32.totalorder %s222_s6, %s858_s23  ;;  %p861_p11 = scmp.lt.s32.totalorder %s859_s7, %s852_s11 }
  0x25   : > { %p856_p9 = pneg %p855_p7 }
  0x26   : > { %p862_p13 = por %p861_p11, %p860_p10 }
  0x28   : > { %p863_p3 = pnand %p862_p13, %p856_p9 }
  0x2a   : > { %866 = shalt.err (!%p863_p3)
}
  0x2b   : > { %s990_s10 = smov 64   ;;  %s991_s17 = smov 4  }
  0x2c   : > { %716 = dma.hbm_to_vmem [thread:$0]  (!%p1141_p4), %s220_s29, 256, %s222_s6, %s211_s30, %s990_s10, %s990_s10, %s991_s17  }
  0x2d   : > { %p663_p0 = scmp.ge.s32.totalorder %s987_s28, 1  ;;  %p235_p1 = scmp.lt.s32.totalorder %s987_s28, 9 }
  0x2f   : > { %p236_p5 = pnand %p663_p0, %p235_p1 }
  0x30   : > { %s241_s26 = sand.u32 (!%p236_p5), 1, %s963_s22  }
  0x31   : > { %239 = sbr.rel (%p236_p5) target bundleno = 1100 (0x44c), region = 40  ;;  %s1152_s8 = sshll.u32 (!%p236_p5), %s241_s26, 4 }
  0x32   : > { %s242_s23 = scalar_lea.sflag (!%p236_p5), [#allocation5], %s241_s26  ;;  %s245_s11 = scalar_lea.vmem (!%p236_p5), [#allocation4], %s1152_s8 }
  0x36   : > { %938 = dma.done.wait (%p1111_p8), %s242_s23, 256  }
  0x37   : > { %940 = vsyncadd (%p1111_p8), %s242_s23, 4294967040  ;;  %s1288_s27 = sand.u32 1, %s951_s19   ;;  %p279_p4 = scmp.lt.s32.totalorder %s975_s25, 1 }
  0x38   : > { %s1163_s6 = sshll.u32 %s1288_s27, 3  ;;  %p283_p6 = scmp.lt.s32.totalorder %s971_s24, 3 }
  0x39   : > { %s280_s9 = scalar_select %p279_p4, %s975_s25, 1 }
  0x3a   : > { %s1168_s13 = scalar_select %p283_p6, %s971_s24, 3 }
  0x3b   : > { %s666_s29 = sshll.u32 %s280_s9, 3  ;;  %s278_s26 = scalar_lea.vmem [#allocation7], %s1163_s6 }
  0x3c   : > { %s1173_s30 = scalar_lea.vmem %s1277_s0, %s666_s29  ;;  %s285_s17 = scalar_lea.vmem %s1281_s4, %s1168_s13 }
  0x3d   : > { %p667_p8 = scmp.ne.s32.totalorder %s971_s24, 0 }
  0x3e   : > { %s998_s14 = smov (!%p667_p8), 127   ;;  %s999_s7 = smov (!%p667_p8), 126  }
  0x3f   : > { %290 = sbr.rel (%p667_p8) target bundleno = 859 (0x35b), region = 48  ;;  %s1000_s10 = smov (!%p667_p8), 125  }
  0x44   : > { %v830_v0 = vld [vmem:[%s1278_s1 + $0x8] sm:$0xff]   ;;  %v992_v1 = vmov 0.0   ;;  %v831_v2 = vld [vmem:[%s1278_s1] sm:$0xff]   ;;  %vm993_vm0 = vmmov 0   ;;  %vm316_vm1 = vcmask 261120   ;;  %vm360_vm2 = vcmask 31744  }
  0x45   : > { %693 = vmatprep.subr.bf16.mxu0 %v992_v1  ;;  %697 = vmatprep.mubr.msk.bf16.mxu0 %vm993_vm0, %v992_v1  ;;  %v291_v3 = vld [vmem:[%s1173_s30] sm:$0xff]  ;;  %450 = vst.msk [vmem:[#allocation3] sm:$0xff] %vm316_vm1, %v992_v1  ;;  %v994_v17 = vmov 2   ;;  %v995_v18 = vmov 0   ;;  %v996_v25 = vmov 1   ;;  %v997_v26 = vmov 3  }
  0x46   : > { %694 = vmatpush3.bf16.msra.mxu0 %v830_v0  ;;  %v292_v4 = vpack.c.bf16 %v291_v3, %v291_v3  ;;  %v668_v5 = vld [vmem:[%s1279_s2] ss:$0 sm:$0xff]  ;;  %827 = vset.pattern.permute.xlu0 %v994_v17  ;;  %v375_v27 = vlaneseq }
  0x47   : > { %695 = vmatprep.subr.bf16.mxu0 %v992_v1  ;;  %825 = vset.pattern.permute.xlu1 %v995_v18 }
  0x48   : > { %v376_v28 = vand.u32 127, %v375_v27 }
  0x4a   : > { %696 = vmatpush3.bf16.msra.mxu0 %v831_v2  ;;  %vm387_vm3 = vcmp.gt.s32.totalorder %v376_v28, 0  ;;  %vm400_vm7 = vcmp.gt.s32.totalorder %v376_v28, 1  ;;  %vm413_vm10 = vcmp.gt.s32.totalorder %v376_v28, 2  ;;  %vm426_vm15 = vcmp.gt.s32.totalorder %v376_v28, 3 }
  0x4d   : > { %698 = vmatmul.mubr.msk.bf16.vlgmr.msra.gmra.mxu0 %vm316_vm1, %v292_v4 }
 0x10d   : > { %v354_v6 = vpop.f32.mrf.mxu0 }
 0x10e   : > { %v355_v7 = vadd.f32 %v668_v5, %v354_v6 }
 0x10f   : > { %v699_v8 = vpop.f32.mrf.mxu0 }
 0x110   : > { %v361_v9 = vsel %vm360_vm2, %v355_v7, -inf }
 0x111   : > { %362 = vmax.xlane.f32.xlu0 %v361_v9  ;;  %v357_v10 = vpop.f32.mrf.mxu0 }
 0x113   : > { %v700_v11 = vpop.f32.mrf.mxu0 }
 0x19a   : > { %v363_v12 = vpop.xlane.xlu0 %362 }
 0x19b   : > { %v364_v13 = vsub.f32 %v355_v7, %v363_v12 }
 0x19d   : > { %v365_v14 = vmul.f32 1.442695, %v364_v13 }
 0x19f   : > { %832 = vpow2.f32 %v365_v14 }
 0x1ac   : > { %v833_v15 = vpop.eup %832 }
 0x1ad   : > { %v367_v16 = vsel %vm360_vm2, %v833_v15, 0.0 }
 0x1ae   : > { %368 = vadd.xlane.f32.xlu0 %v367_v16 }
 0x237   : > { %v369_v19 = vpop.xlane.xlu0 %368 }
 0x238   : > { %834 = vrcp.f32 %v369_v19 }
 0x245   : > { %v835_v20 = vpop.eup %834 }
 0x246   : > { %v371_v21 = vmul.f32 %v835_v20, %v369_v19 }
 0x248   : > { %v372_v22 = vsub.f32 2.0, %v371_v21 }
 0x24a   : > { %v373_v23 = vmul.f32 %v835_v20, %v372_v22 }
 0x24c   : > { %v374_v24 = vmul.f32 %v833_v15, %v373_v23 }
 0x24e   : > { %405 = vperm.xlu0 %827, %v374_v24   ;;  %379 = vperm.xlu1 %825, %v374_v24  }
 0x252   : > { %826 = vset.pattern.permute.xlu1 %v996_v25  ;;  %829 = vset.pattern.permute.xlu0 %v997_v26 }
 0x253   : > { %392 = vperm.xlu1 %826, %v374_v24  }
 0x257   : > { %828 = vset.pattern.permute.xlu1 %v997_v26 }
 0x258   : > { %418 = vperm.xlu1 %828, %v374_v24  }
 0x2c9   : > { %v380_v29 = vpop.permute.xlu1 %379  ;;  %v406_v31 = vpop.permute.xlu0 %405 }
 0x2ca   : > { %vm382_vm4 = vcmp.gt.f32.partialorder %v380_v29, %v374_v24  ;;  %vm386_vm5 = vcmp.eq.f32.partialorder %v380_v29, %v374_v24  ;;  %vm412_vm11 = vcmp.eq.f32.partialorder %v406_v31, %v374_v24  ;;  %vm408_vm13 = vcmp.gt.f32.partialorder %v406_v31, %v374_v24 }
 0x2cb   : > { %v672_v30 = vsel %vm382_vm4, 1.0, %v992_v1  ;;  %vm388_vm6 = vmand %vm386_vm5, %vm387_vm3  ;;  %v674_v40 = vsel %vm408_vm13, 1.0, %v992_v1  ;;  %vm432_vm3 = vcmask 7168  }
 0x2cc   : > { %v389_v32 = vsel %vm388_vm6, 1.0, %v992_v1  ;;  %vm414_vm14 = vmand %vm412_vm11, %vm413_vm10 }
 0x2cd   : > { %v390_v34 = vadd.f32 %v672_v30, %v389_v32  ;;  %v415_v42 = vsel %vm414_vm14, 1.0, %v992_v1 }
 0x2ce   : > { %v393_v33 = vpop.permute.xlu1 %392 }
 0x2cf   : > { %vm395_vm8 = vcmp.gt.f32.partialorder %v393_v33, %v374_v24  ;;  %vm399_vm9 = vcmp.eq.f32.partialorder %v393_v33, %v374_v24 }
 0x2d0   : > { %v673_v35 = vsel %vm395_vm8, 1.0, %v992_v1  ;;  %vm401_vm12 = vmand %vm399_vm9, %vm400_vm7 }
 0x2d1   : > { %v398_v36 = vadd.f32 %v673_v35, %v390_v34  ;;  %v402_v37 = vsel %vm401_vm12, 1.0, %v992_v1 }
 0x2d3   : > { %v403_v38 = vadd.f32 %v402_v37, %v398_v36  ;;  %v419_v39 = vpop.permute.xlu1 %418 }
 0x2d4   : > { %vm425_vm0 = vcmp.eq.f32.partialorder %v419_v39, %v374_v24  ;;  %vm421_vm1 = vcmp.gt.f32.partialorder %v419_v39, %v374_v24 }
 0x2d5   : > { %v411_v41 = vadd.f32 %v674_v40, %v403_v38  ;;  %vm427_vm2 = vmand %vm425_vm0, %vm426_vm15  ;;  %v675_v44 = vsel %vm421_vm1, 1.0, %v992_v1 }
 0x2d6   : > { %v428_v46 = vsel %vm427_vm2, 1.0, %v992_v1 }
 0x2d7   : > { %v416_v43 = vadd.f32 %v415_v42, %v411_v41 }
 0x2d9   : > { %v424_v45 = vadd.f32 %v675_v44, %v416_v43 }
 0x2db   : > { %v429_v47 = vadd.f32 %v428_v46, %v424_v45 }
 0x2dd   : > { %vm430_vm4 = vcmp.lt.f32.partialorder %v429_v47, 2.0 }
 0x2de   : > { %v431_v48 = vsel %vm430_vm4, %v374_v24, 0.0 }
 0x2df   : > { %435 = vrot.lane.b32.xlu1 %v431_v48, %s998_s14  ;;  %433 = vst.msk [vmem:[#allocation2] sm:$0xff] %vm432_vm3, %v431_v48 }
 0x2e3   : > { %440 = vrot.lane.b32.xlu1 %v431_v48, %s999_s7 }
 0x2e7   : > { %445 = vrot.lane.b32.xlu1 %v431_v48, %s1000_s10 }
 0x351   : > { %v436_v49 = vpop.permute.xlu1 %435 }
 0x352   : > { %439 = vst.msk [vmem:[#allocation2 + $0x8] sm:$0xff] %vm432_vm3, %v436_v49 }
 0x355   : > { %v441_v50 = vpop.permute.xlu1 %440 }
 0x356   : > { %444 = vst.msk [vmem:[#allocation2 + $0x10] sm:$0xff] %vm432_vm3, %v441_v50 }
 0x359   : > { %v446_v51 = vpop.permute.xlu1 %445 }
 0x35a   : > { %449 = vst.msk [vmem:[#allocation2 + $0x18] sm:$0xff] %vm432_vm3, %v446_v51 }
 0x35b PF: > { %v837_v52 = vld [vmem:[%s245_s11 + $0x8] sm:$0xff]   ;;  %v1001_v53 = vmov 0.0   ;;  %v838_v54 = vld [vmem:[%s245_s11] sm:$0xff]   ;;  %vm1002_vm5 = vmmov 0   ;;  %s680_s23 = sshll.u32 %s971_s24, 3  ;;  %v1003_v56 = vmov 0  }
 0x35c   : > { %701 = vmatprep.subr.bf16.mxu0 %v1001_v53  ;;  %705 = vmatprep.mubr.msk.bf16.mxu0 %vm1002_vm5, %v1001_v53  ;;  %v451_v55 = vld [vmem:[%s1173_s30] sm:$0xff]  ;;  %s522_s9 = scalar_lea.vmem [#allocation2], %s680_s23  ;;  %vm476_vm6 = vcmask 261120   ;;  %p681_p7 = scmp.ne.s32.totalorder %s971_s24, 3 }
 0x35d   : > { %702 = vmatpush3.bf16.msra.mxu0 %v837_v52  ;;  %836 = vset.pattern.permute.xlu0 %v1003_v56  ;;  %v452_v58 = vpack.c.bf16 %v451_v55, %v451_v55  ;;  %v676_v59 = vld [vmem:[%s285_s17] ss:$0 sm:$0xff] }
 0x35e   : > { %703 = vmatprep.subr.bf16.mxu0 %v1001_v53  ;;  %v520_v63 = vld [vmem:[#allocation3] sm:$0xff] }
 0x361   : > { %v523_v57 = vld [vmem:[%s522_s9] sm:$0xff]  ;;  %704 = vmatpush3.bf16.msra.mxu0 %v838_v54 }
 0x362   : > { %526 = vperm.xlu0 %836, %v523_v57  }
 0x364   : > { %706 = vmatmul.mubr.msk.bf16.vlgmr.msra.gmra.mxu0 %vm476_vm6, %v452_v58 }
 0x3dd   : > { %v527_v61 = vpop.permute.xlu0 %526 }
 0x424   : > { %v514_v60 = vpop.f32.mrf.mxu0 }
 0x425   : > { %v515_v62 = vadd.f32 %v676_v59, %v514_v60 }
 0x426   : > { %v707_v0 = vpop.f32.mrf.mxu0 }
 0x427   : > { %v529_v1 = vmul.f32 %v527_v61, %v515_v62  ;;  %535 = sbr.rel (%p681_p7) target bundleno = 1076 (0x434), region = 52 }
 0x428   : > { %v517_v2 = vpop.f32.mrf.mxu0 }
 0x429   : > { %v530_v3 = vadd.f32 %v529_v1, %v520_v63 }
 0x42a   : > { %v708_v4 = vpop.f32.mrf.mxu0 }
 0x42b   : > { %531 = vst.msk [vmem:[#allocation3] sm:$0xff] %vm476_vm6, %v530_v3 }
 0x432   : > { %v536_v5 = vld [vmem:[#allocation3] sm:$0xff] }
 0x433   : > { %537 = vst.msk [vmem:[%s278_s26] sm:$0xff] %vm476_vm6, %v536_v5 }
 0x434 PF: > { %s683_s8 = sshll.u32 %s975_s25, 7  ;;  %s552_s17 = sshll.u32 %s278_s26, 4  ;;  %s553_s17 = int_to_ptr.vmem [resolvable:$true] %s552_s17 }
 0x435   : > { %s550_s30 = scalar_lea.hbm %s1282_s5, %s683_s8  ;;  %s1300_s24 = sand.u32 1, %s951_s19  }
 0x436   : > { %s539_s12 = scalar_lea.sflag [#allocation6], %s1300_s24  ;;  %s867_s14 = scalar_lea.vmem %s553_s17, 128 }
 0x437   : > { %p868_p9 = scmp.ne.s32.totalorder %s553_s17, %s867_s14  ;;  %s1004_s7 = smov [#allocation7]  }
 0x438   : > { %s871_s10 = sshll.u32 %s1004_s7, 4  ;;  %s872_s10 = int_to_ptr.vmem [resolvable:$false] %s871_s10 }
 0x439   : > { %p869_p10 = pnand %p868_p9, %p1123_p12  ;;  %s873_s23 = scalar_lea.vmem %s872_s10, 256 }
 0x43a   : > { %p874_p13 = scmp.lt.s32.totalorder %s553_s17, %s872_s10  ;;  %p875_p3 = scmp.lt.s32.totalorder %s873_s23, %s867_s14 }
 0x43b   : > { %p870_p11 = pneg %p869_p10 }
 0x43c   : > { %p876_p0 = por %p875_p3, %p874_p13 }
 0x43e   : > { %p877_p1 = pnand %p876_p0, %p870_p11 }
 0x440   : > { %880 = shalt.err (!%p877_p1)
}
 0x441   : > { %s881_s25 = scalar_lea.hbm %s550_s30, 128  ;;  %s885_s9 = scalar_lea.hbm %s1282_s5, 256 }
 0x442   : > { %p882_p5 = scmp.ne.s32.totalorder %s550_s30, %s881_s25  ;;  %p886_p8 = scmp.lt.s32.totalorder %s550_s30, %s1282_s5 }
 0x443   : > { %p887_p7 = scmp.lt.s32.totalorder %s885_s9, %s881_s25 }
 0x444   : > { %p883_p4 = pnand %p882_p5, %p1123_p12 }
 0x445   : > { %p888_p9 = por %p887_p7, %p886_p8 }
 0x446   : > { %p884_p6 = pneg %p883_p4 }
 0x448   : > { %p889_p10 = pnand %p888_p9, %p884_p6 }
 0x44a   : > { %892 = shalt.err (!%p889_p10)
}
 0x44b   : > { %711 = dma.vmem_to_hbm [thread:$0]  (%p1123_p12), %s553_s17, 128, %s550_s30, %s539_s12  }
 0x44c PF: > { %p722_p11 = scmp.ge.s32.totalorder %s987_s28, 2  ;;  %s564_s8 = sand.u32 1, %s947_s18  }
 0x44d   : > { %s565_s11 = scalar_lea.sflag [#allocation6], %s564_s8 }
 0x44e   : > { %p718_p13 = pnand %p722_p11, %p1131_p2 }
 0x450   : > { %p719_p3 = pneg %p718_p13 }
 0x452   : > { %942 = dma.done.wait (%p719_p3), %s565_s11, 128  }
 0x453   : > { %944 = vsyncadd (%p719_p3), %s565_s11, 4294967168  ;;  %s21_s28 = sadd.s32 1, %s987_s28   ;;  %s1301_s16 = sld [smem:[#allocation10_spill]] }
 0x454   : > { %p18_p0 = scmp.ge.s32.totalorder %s21_s28, 10   ;;  %s1302_s23 = sld [smem:[#allocation15_spill]] }
 0x455   : > { %s1303_s24 = sld [smem:[#allocation11_spill]]  ;;  %s1307_s18 = smov %s951_s19 }
 0x456   : > { %s1304_s25 = sld [smem:[#allocation12_spill]]  ;;  %s1308_s19 = smov %s955_s20 }
 0x457   : > { %s1305_s26 = sld [smem:[#allocation13_spill]]  ;;  %s1309_s20 = smov %s1121_s15 }
 0x458   : > { %s1306_s27 = sld [smem:[#allocation14_spill]]  ;;  %s1310_s21 = smov %s963_s22 }
 0x459   : > { %s1311_s22 = smov %s1301_s16  ;;  %20 = sbr.rel (!%p18_p0) target bundleno = 9 (0x9), region = 103 }
 0x45e   :  { %570 = vsyncpa [#allocation5], 1 }
 0x45f   :  { %572 = vsyncpa [#allocation5 + $0x1], 1 }
 0x460   :  { %573 = vsyncpa [#allocation6], 1 }
 0x461   :  { %575 = vsyncpa [#allocation6 + $0x1], 1 }

</bundles_post_ra>
